<compile_context>
chip_gen: v7x
topology: tpu7x:2x2x1
jax: 0.10.0
libtpu: 0.0.40
codegen_flags: <defaults>
</compile_context>

<pallas_src>
import jax
import jax.numpy as jnp
import numpy as np
from jax.experimental import pallas as pl
from jax.experimental.pallas import tpu as pltpu


def _sed_kernel(xi_ref, y_ref,                 # (T, tb, Dxi), (T, tb, Dy)
                w1x_ref, w1y_ref, b1_ref,      # encoder L1 split: (Dxi,H), (Dy,H), (1,H)
                w2_ref, b2_ref,                # encoder L2: (H, E), (1, E)
                w3_ref, b3_ref,                # emitter L1: (E, H2), (1, H2)
                w4_ref, b4_ref,                # emitter L2: (H2, Dout), (1, Dout)
                out_ref):                      # (tb, Dout)
    T, tb, Dxi = xi_ref.shape
    Dy = y_ref.shape[-1]

    # Collapse the set axis into the row axis -> one big matmul per layer.
    # tb is a multiple of 8, so this reshape is sublane-tile aligned.
    xi2d = xi_ref[...].reshape(T * tb, Dxi)
    y2d = y_ref[...].reshape(T * tb, Dy)

    # Encoder layer 1: concat(xi, y) @ w1 fused as split matmuls, + bias, ReLU.
    h = (jnp.dot(xi2d, w1x_ref[...], preferred_element_type=jnp.float32)
         + jnp.dot(y2d, w1y_ref[...], preferred_element_type=jnp.float32)
         + b1_ref[...])
    h = jnp.maximum(h, 0.0)

    # Encoder layer 2 (per-pair bias included, matching the reference sum).
    e = jnp.dot(h, w2_ref[...], preferred_element_type=jnp.float32) + b2_ref[...]

    # Sum the T encodings: static, sublane-aligned slices (tb % 8 == 0).
    s = e[0:tb]
    for t in range(1, T):
        s = s + e[t * tb:(t + 1) * tb]

    # Emitter MLP.
    h2 = jnp.maximum(
        jnp.dot(s, w3_ref[...], preferred_element_type=jnp.float32) + b3_ref[...],
        0.0)
    o = jnp.dot(h2, w4_ref[...], preferred_element_type=jnp.float32) + b4_ref[...]
    out_ref[...] = o.astype(out_ref.dtype)


def _round_up(x, m):
    return (x + m - 1) // m * m


def set_equivariant_design_network(xi, y, params, *, batch_tile=512):
    """xi: [T, B, Dxi], y: [T, B, Dy]. Returns emitter(sum_t encoder(concat(xi_t, y_t)))."""
    w1, b1, w2, b2, w3, b3, w4, b4 = params
    T, B, Dxi = xi.shape
    Dy = y.shape[-1]
    H = w1.shape[1]
    E = w2.shape[1]
    H2 = w3.shape[1]
    Dout = w4.shape[1]

    xi = xi.astype(jnp.float32)
    y = y.astype(jnp.float32)

    # Fuse the concat into layer 1 by splitting its weight over the xi / y blocks.
    w1x = w1[:Dxi].astype(jnp.float32)
    w1y = w1[Dxi:].astype(jnp.float32)
    b1r, b2r, b3r, b4r = (b.reshape(1, -1).astype(jnp.float32)
                          for b in (b1, b2, b3, b4))

    # Batch tile: multiple of 8 sublanes, capped (tiny vs. 64 MiB v7x VMEM even
    # at 512 rows:  512*(Dxi+Dy+H+E+H2+Dout)*4B  <<  1 MiB  for these widths).
    tb = min(batch_tile, _round_up(B, 8))
    Bp = _round_up(B, tb)
    if Bp != B:
        pad = Bp - B
        xi = jnp.pad(xi, ((0, 0), (0, pad), (0, 0)))
        y = jnp.pad(y, ((0, 0), (0, pad), (0, 0)))

    def full(a):
        return pl.BlockSpec(a.shape, lambda b: (0,) * a.ndim)

    flops = int(2 * T * B * ((Dxi + Dy) * H + H * E) + 2 * B * (E * H2 + H2 * Dout))
    bytes_accessed = int(4 * (xi.size + y.size + w1.size + w2.size + w3.size + w4.size
                              + b1.size + b2.size + b3.size + b4.size + Bp * Dout))

    out = pl.pallas_call(
        _sed_kernel,
        out_shape=jax.ShapeDtypeStruct((Bp, Dout), jnp.float32),
        grid=(Bp // tb,),
        in_specs=[
            pl.BlockSpec((T, tb, Dxi), lambda b: (0, b, 0)),   # xi batch tile
            pl.BlockSpec((T, tb, Dy), lambda b: (0, b, 0)),    # y  batch tile
            full(w1x), full(w1y), full(b1r),
            full(w2), full(b2r),
            full(w3), full(b3r),
            full(w4), full(b4r),
        ],
        out_specs=pl.BlockSpec((tb, Dout), lambda b: (b, 0)),
        compiler_params=pltpu.CompilerParams(
            dimension_semantics=("parallel",),                 # shard batch tiles across TCs
        ),
        cost_estimate=pl.CostEstimate(
            flops=flops, transcendentals=0, bytes_accessed=bytes_accessed),
    )(xi, y, w1x, w1y, b1r, w2, b2r, w3, b3r, w4, b4r)

    return out[:B]


def _reference(xi, y, params):
    w1, b1, w2, b2, w3, b3, w4, b4 = params
    x = jnp.concatenate([xi, y], axis=-1).astype(jnp.float32)
    h = jax.nn.relu(jnp.einsum('tbd,dh->tbh', x, w1) + b1)
    e = jnp.einsum('tbh,he->tbe', h, w2) + b2
    s = jnp.sum(e, axis=0)
    h2 = jax.nn.relu(s @ w3 + b3)
    return h2 @ w4 + b4


if __name__ == "__main__":
    # Small shapes implied by the forward: T pairs of (design [B, Dxi], obs [B, Dy]).
    T, B = 3, 8
    Dxi, Dy = 4, 1
    D = Dxi + Dy
    H, E, H2 = 32, 32, 32
    Dout = Dxi

    key = jax.random.PRNGKey(0)
    keys = jax.random.split(key, 10)

    xi = jax.random.normal(keys[0], (T, B, Dxi), dtype=jnp.float32)
    y = jax.random.normal(keys[1], (T, B, Dy), dtype=jnp.float32)

    def init_linear(k, fan_in, fan_out):
        kw, kb = jax.random.split(k)
        bound = 1.0 / np.sqrt(fan_in)
        w = jax.random.uniform(kw, (fan_in, fan_out), jnp.float32, -bound, bound)
        b = jax.random.uniform(kb, (fan_out,), jnp.float32, -bound, bound)
        return w, b

    w1, b1 = init_linear(keys[2], D, H)      # encoder layer 1
    w2, b2 = init_linear(keys[3], H, E)      # encoder layer 2
    w3, b3 = init_linear(keys[4], E, H2)     # emitter layer 1
    w4, b4 = init_linear(keys[5], H2, Dout)  # emitter layer 2
    params = (w1, b1, w2, b2, w3, b3, w4, b4)

    out = set_equivariant_design_network(xi, y, params)
    out = jax.block_until_ready(out)

    ref = _reference(xi, y, params)
    np.testing.assert_allclose(np.asarray(out), np.asarray(ref), rtol=1e-5, atol=1e-5)

    print("KERNEL_OK")
</pallas_src>

<mosaic_0001>
module attributes {stable_mosaic.version = 11 : i64} {
  func.func @_sed_kernel(%arg0: i32, %arg1: memref<3x8x4xf32, #tpu.memory_space<vmem>>, %arg2: memref<3x8x1xf32, #tpu.memory_space<vmem>>, %arg3: memref<4x32xf32, #tpu.memory_space<vmem>>, %arg4: memref<1x32xf32, #tpu.memory_space<vmem>>, %arg5: memref<1x32xf32, #tpu.memory_space<vmem>>, %arg6: memref<32x32xf32, #tpu.memory_space<vmem>>, %arg7: memref<1x32xf32, #tpu.memory_space<vmem>>, %arg8: memref<32x32xf32, #tpu.memory_space<vmem>>, %arg9: memref<1x32xf32, #tpu.memory_space<vmem>>, %arg10: memref<32x4xf32, #tpu.memory_space<vmem>>, %arg11: memref<1x4xf32, #tpu.memory_space<vmem>>, %arg12: memref<8x4xf32, #tpu.memory_space<vmem>>) attributes {dimension_semantics = [#tpu.dimension_semantics<parallel>], iteration_bounds = array<i64: 1>, scalar_prefetch = 0 : i64, scratch_operands = 0 : i64, tpu.core_type = #tpu.core_type<tc>, window_params = [{transform_indices = @transform_0, window_bounds = array<i64: 3, 8, 4>}, {transform_indices = @transform_1, window_bounds = array<i64: 3, 8, 1>}, {pipeline_mode = #tpu.pipeline_mode<synchronous>, transform_indices = @transform_2, window_bounds = array<i64: 4, 32>}, {pipeline_mode = #tpu.pipeline_mode<synchronous>, transform_indices = @transform_3, window_bounds = array<i64: 1, 32>}, {pipeline_mode = #tpu.pipeline_mode<synchronous>, transform_indices = @transform_4, window_bounds = array<i64: 1, 32>}, {pipeline_mode = #tpu.pipeline_mode<synchronous>, transform_indices = @transform_5, window_bounds = array<i64: 32, 32>}, {pipeline_mode = #tpu.pipeline_mode<synchronous>, transform_indices = @transform_6, window_bounds = array<i64: 1, 32>}, {pipeline_mode = #tpu.pipeline_mode<synchronous>, transform_indices = @transform_7, window_bounds = array<i64: 32, 32>}, {pipeline_mode = #tpu.pipeline_mode<synchronous>, transform_indices = @transform_8, window_bounds = array<i64: 1, 32>}, {pipeline_mode = #tpu.pipeline_mode<synchronous>, transform_indices = @transform_9, window_bounds = array<i64: 32, 4>}, {pipeline_mode = #tpu.pipeline_mode<synchronous>, transform_indices = @transform_10, window_bounds = array<i64: 1, 4>}, {transform_indices = @transform_11, window_bounds = array<i64: 8, 4>}]} {
    %c0 = arith.constant 0 : index
    %c0_0 = arith.constant 0 : index
    %c0_1 = arith.constant 0 : index
    %0 = vector.load %arg1[%c0, %c0_0, %c0_1] : memref<3x8x4xf32, #tpu.memory_space<vmem>>, vector<3x8x4xf32>
    %1 = vector.shape_cast %0 : vector<3x8x4xf32> to vector<24x4xf32>
    %c0_2 = arith.constant 0 : index
    %c0_3 = arith.constant 0 : index
    %c0_4 = arith.constant 0 : index
    %2 = vector.load %arg2[%c0_2, %c0_3, %c0_4] : memref<3x8x1xf32, #tpu.memory_space<vmem>>, vector<3x8x1xf32>
    %3 = vector.shape_cast %2 : vector<3x8x1xf32> to vector<24x1xf32>
    %c0_5 = arith.constant 0 : index
    %c0_6 = arith.constant 0 : index
    %4 = vector.load %arg3[%c0_5, %c0_6] : memref<4x32xf32, #tpu.memory_space<vmem>>, vector<4x32xf32>
    %cst = arith.constant dense<0.000000e+00> : vector<24x32xf32>
    %5 = tpu.matmul %1, %4, %cst {dimension_numbers = #tpu.dot_dimension_numbers<[1], [0], [0], [1], [0, 0, 1, 1], [], []>} : vector<24x4xf32>, vector<4x32xf32>, vector<24x32xf32> -> vector<24x32xf32>
    %c0_7 = arith.constant 0 : index
    %c0_8 = arith.constant 0 : index
    %6 = vector.load %arg4[%c0_7, %c0_8] : memref<1x32xf32, #tpu.memory_space<vmem>>, vector<1x32xf32>
    %cst_9 = arith.constant dense<0.000000e+00> : vector<24x32xf32>
    %7 = tpu.matmul %3, %6, %cst_9 {dimension_numbers = #tpu.dot_dimension_numbers<[1], [0], [0], [1], [0, 0, 1, 1], [], []>} : vector<24x1xf32>, vector<1x32xf32>, vector<24x32xf32> -> vector<24x32xf32>
    %8 = arith.addf %5, %7 : vector<24x32xf32>
    %c0_10 = arith.constant 0 : index
    %c0_11 = arith.constant 0 : index
    %9 = vector.load %arg5[%c0_10, %c0_11] : memref<1x32xf32, #tpu.memory_space<vmem>>, vector<1x32xf32>
    %10 = vector.broadcast %9 : vector<1x32xf32> to vector<24x32xf32>
    %11 = arith.addf %8, %10 : vector<24x32xf32>
    %cst_12 = arith.constant 0.000000e+00 : f32
    %12 = vector.broadcast %cst_12 : f32 to vector<24x32xf32>
    %13 = arith.maximumf %11, %12 : vector<24x32xf32>
    %c0_13 = arith.constant 0 : index
    %c0_14 = arith.constant 0 : index
    %14 = vector.load %arg6[%c0_13, %c0_14] : memref<32x32xf32, #tpu.memory_space<vmem>>, vector<32x32xf32>
    %cst_15 = arith.constant dense<0.000000e+00> : vector<24x32xf32>
    %15 = tpu.matmul %13, %14, %cst_15 {dimension_numbers = #tpu.dot_dimension_numbers<[1], [0], [0], [1], [0, 0, 1, 1], [], []>} : vector<24x32xf32>, vector<32x32xf32>, vector<24x32xf32> -> vector<24x32xf32>
    %c0_16 = arith.constant 0 : index
    %c0_17 = arith.constant 0 : index
    %16 = vector.load %arg7[%c0_16, %c0_17] : memref<1x32xf32, #tpu.memory_space<vmem>>, vector<1x32xf32>
    %17 = vector.broadcast %16 : vector<1x32xf32> to vector<24x32xf32>
    %18 = arith.addf %15, %17 : vector<24x32xf32>
    %19 = vector.extract_strided_slice %18 {offsets = [0, 0], sizes = [8, 32], strides = [1, 1]} : vector<24x32xf32> to vector<8x32xf32>
    %20 = vector.extract_strided_slice %18 {offsets = [8, 0], sizes = [8, 32], strides = [1, 1]} : vector<24x32xf32> to vector<8x32xf32>
    %21 = arith.addf %19, %20 : vector<8x32xf32>
    %22 = vector.extract_strided_slice %18 {offsets = [16, 0], sizes = [8, 32], strides = [1, 1]} : vector<24x32xf32> to vector<8x32xf32>
    %23 = arith.addf %21, %22 : vector<8x32xf32>
    %c0_18 = arith.constant 0 : index
    %c0_19 = arith.constant 0 : index
    %24 = vector.load %arg8[%c0_18, %c0_19] : memref<32x32xf32, #tpu.memory_space<vmem>>, vector<32x32xf32>
    %cst_20 = arith.constant dense<0.000000e+00> : vector<8x32xf32>
    %25 = tpu.matmul %23, %24, %cst_20 {dimension_numbers = #tpu.dot_dimension_numbers<[1], [0], [0], [1], [0, 0, 1, 1], [], []>} : vector<8x32xf32>, vector<32x32xf32>, vector<8x32xf32> -> vector<8x32xf32>
    %c0_21 = arith.constant 0 : index
    %c0_22 = arith.constant 0 : index
    %26 = vector.load %arg9[%c0_21, %c0_22] : memref<1x32xf32, #tpu.memory_space<vmem>>, vector<1x32xf32>
    %27 = vector.broadcast %26 : vector<1x32xf32> to vector<8x32xf32>
    %28 = arith.addf %25, %27 : vector<8x32xf32>
    %cst_23 = arith.constant 0.000000e+00 : f32
    %29 = vector.broadcast %cst_23 : f32 to vector<8x32xf32>
    %30 = arith.maximumf %28, %29 : vector<8x32xf32>
    %c0_24 = arith.constant 0 : index
    %c0_25 = arith.constant 0 : index
    %31 = vector.load %arg10[%c0_24, %c0_25] : memref<32x4xf32, #tpu.memory_space<vmem>>, vector<32x4xf32>
    %cst_26 = arith.constant dense<0.000000e+00> : vector<8x4xf32>
    %32 = tpu.matmul %30, %31, %cst_26 {dimension_numbers = #tpu.dot_dimension_numbers<[1], [0], [0], [1], [0, 0, 1, 1], [], []>} : vector<8x32xf32>, vector<32x4xf32>, vector<8x4xf32> -> vector<8x4xf32>
    %c0_27 = arith.constant 0 : index
    %c0_28 = arith.constant 0 : index
    %33 = vector.load %arg11[%c0_27, %c0_28] : memref<1x4xf32, #tpu.memory_space<vmem>>, vector<1x4xf32>
    %34 = vector.broadcast %33 : vector<1x4xf32> to vector<8x4xf32>
    %35 = arith.addf %32, %34 : vector<8x4xf32>
    %c0_29 = arith.constant 0 : index
    %c0_30 = arith.constant 0 : index
    %36 = vector.load %arg12[%c0_29, %c0_30] : memref<8x4xf32, #tpu.memory_space<vmem>>, vector<8x4xf32>
    tpu.vector_store %arg12[%c0_29, %c0_30], %35 {strides = array<i32>} : memref<8x4xf32, #tpu.memory_space<vmem>>, vector<8x4xf32>,
    return
  }
  func.func @transform_0(%arg0: i32) -> (i32, i32, i32) {
    %c0_i32 = arith.constant 0 : i32
    %c0_i32_0 = arith.constant 0 : i32
    %c0_i32_1 = arith.constant 0 : i32
    return %c0_i32, %arg0, %c0_i32_0 : i32, i32, i32
  }
  func.func @transform_1(%arg0: i32) -> (i32, i32, i32) {
    %c0_i32 = arith.constant 0 : i32
    %c0_i32_0 = arith.constant 0 : i32
    %c0_i32_1 = arith.constant 0 : i32
    return %c0_i32, %arg0, %c0_i32_0 : i32, i32, i32
  }
  func.func @transform_2(%arg0: i32) -> (i32, i32) {
    %c0_i32 = arith.constant 0 : i32
    %c0_i32_0 = arith.constant 0 : i32
    %c0_i32_1 = arith.constant 0 : i32
    return %c0_i32, %c0_i32_0 : i32, i32
  }
  func.func @transform_3(%arg0: i32) -> (i32, i32) {
    %c0_i32 = arith.constant 0 : i32
    %c0_i32_0 = arith.constant 0 : i32
    %c0_i32_1 = arith.constant 0 : i32
    return %c0_i32, %c0_i32_0 : i32, i32
  }
  func.func @transform_4(%arg0: i32) -> (i32, i32) {
    %c0_i32 = arith.constant 0 : i32
    %c0_i32_0 = arith.constant 0 : i32
    %c0_i32_1 = arith.constant 0 : i32
    return %c0_i32, %c0_i32_0 : i32, i32
  }
  func.func @transform_5(%arg0: i32) -> (i32, i32) {
    %c0_i32 = arith.constant 0 : i32
    %c0_i32_0 = arith.constant 0 : i32
    %c0_i32_1 = arith.constant 0 : i32
    return %c0_i32, %c0_i32_0 : i32, i32
  }
  func.func @transform_6(%arg0: i32) -> (i32, i32) {
    %c0_i32 = arith.constant 0 : i32
    %c0_i32_0 = arith.constant 0 : i32
    %c0_i32_1 = arith.constant 0 : i32
    return %c0_i32, %c0_i32_0 : i32, i32
  }
  func.func @transform_7(%arg0: i32) -> (i32, i32) {
    %c0_i32 = arith.constant 0 : i32
    %c0_i32_0 = arith.constant 0 : i32
    %c0_i32_1 = arith.constant 0 : i32
    return %c0_i32, %c0_i32_0 : i32, i32
  }
  func.func @transform_8(%arg0: i32) -> (i32, i32) {
    %c0_i32 = arith.constant 0 : i32
    %c0_i32_0 = arith.constant 0 : i32
    %c0_i32_1 = arith.constant 0 : i32
    return %c0_i32, %c0_i32_0 : i32, i32
  }
  func.func @transform_9(%arg0: i32) -> (i32, i32) {
    %c0_i32 = arith.constant 0 : i32
    %c0_i32_0 = arith.constant 0 : i32
    %c0_i32_1 = arith.constant 0 : i32
    return %c0_i32, %c0_i32_0 : i32, i32
  }
  func.func @transform_10(%arg0: i32) -> (i32, i32) {
    %c0_i32 = arith.constant 0 : i32
    %c0_i32_0 = arith.constant 0 : i32
    %c0_i32_1 = arith.constant 0 : i32
    return %c0_i32, %c0_i32_0 : i32, i32
  }
  func.func @transform_11(%arg0: i32) -> (i32, i32) {
    %c0_i32 = arith.constant 0 : i32
    %c0_i32_0 = arith.constant 0 : i32
    return %arg0, %c0_i32 : i32, i32
  }
}

</mosaic_0001>

<bundles_post_ra>
// kernel: tpu_custom_call.1
= control target key start
LH: loop header
LB: loop body
LE: loop exit
PB: predicated region body
PF: predicated region fallthrough
CT: control target
= control target key end

     0   :  { %vm56_vm0 = vcmask 1040384   ;;  %vm150_vm1 = vcmask 1043456   ;;  %v655_v0 = vmov 0.0   ;;  %vm46_vm2 = vcmask 7168   ;;  %s836_s3 = inlined_call_operand.vmem [shape: f32[1,32], index: 3, kind: input, shape index: {}]   ;;  %s837_s2 = inlined_call_operand.vmem [shape: f32[4,32], index: 2, kind: input, shape index: {}]   ;;  %s838_s1 = inlined_call_operand.vmem [shape: f32[3,8,1], index: 1, kind: input, shape index: {}]   ;;  %s839_s0 = inlined_call_operand.vmem [shape: f32[3,8,4], index: 0, kind: input, shape index: {}]   ;;  %s840_s5 = inlined_call_operand.vmem [shape: f32[32,32], index: 5, kind: input, shape index: {}]   ;;  %s841_s7 = inlined_call_operand.vmem [shape: f32[32,32], index: 7, kind: input, shape index: {}]   ;;  %s842_s4 = inlined_call_operand.vmem [shape: f32[1,32], index: 4, kind: input, shape index: {}]   ;;  %s843_s6 = inlined_call_operand.vmem [shape: f32[1,32], index: 6, kind: input, shape index: {}]   ;;  %s844_s9 = inlined_call_operand.vmem [shape: f32[32,4], index: 9, kind: input, shape index: {}]   ;;  %s845_s8 = inlined_call_operand.vmem [shape: f32[1,32], index: 8, kind: input, shape index: {}]   ;;  %s846_s10 = inlined_call_operand.vmem [shape: f32[1,4], index: 10, kind: input, shape index: {}]   ;;  %s847_s11 = inlined_call_operand.vmem [shape: f32[8,4], index: 11, kind: output, shape index: {}]  }
   0x1   :  { %566 = vmatprep.subr.mxu0 %v655_v0  ;;  %577 = vmatprep.subr.mxu1 %v655_v0  ;;  %v45_v1 = vld [vmem:[%s836_s3] sm:$0x1]  ;;  %vm656_vm3 = vmmov 0   ;;  %vm140_vm4 = vcmask 31744   ;;  %v248_v6 = vld [vmem:[%s840_s5 + $0x8] sm:$0xff]  ;;  %v657_v10 = vmov 0.0|0.0  }
   0x2   :  { %v44_v2 = vld [vmem:[%s837_s2] sm:$0xf]  ;;  %567 = vmatpush3.msk.msra.mxu0 %vm56_vm0, %v45_v1  ;;  %568 = vmatprep.mubr.msk.f32.mxu0 %vm656_vm3, %v655_v0  ;;  %v42_v7 = vld [vmem:[%s838_s1 + $0x8] sm:$0xff]  ;;  %v43_v11 = vld [vmem:[%s838_s1 + $0x10] sm:$0xff]  ;;  %vm258_vm5 = vcmask 261120  }
   0x3   :  { %v41_v3 = vld [vmem:[%s838_s1] sm:$0xff]  ;;  %578 = vmatpush3.msk.msra.mxu1 %vm150_vm1, %v44_v2  ;;  %579 = vmatprep.mubr.msk.f32.mxu1 %vm656_vm3, %v655_v0  ;;  %v39_v8 = vld [vmem:[%s839_s0 + $0x8] sm:$0xff]  ;;  %v40_v12 = vld [vmem:[%s839_s0 + $0x10] sm:$0xff] }
   0x4   :  { %v38_v4 = vld [vmem:[%s839_s0] sm:$0xff]  ;;  %569 = vmatmul.mubr.msk.f32.vlgmr.msra.gmra.mrb[0].mxu0 %vm46_vm2, %v41_v3  ;;  %627 = vmatprep.subr.bf16.mxu0 %v657_v10  ;;  %v249_v13 = vld [vmem:[%s840_s5 + $0x10] sm:$0xff]  ;;  %v250_v14 = vld [vmem:[%s840_s5 + $0x18] sm:$0xff] }
   0x5   :  { %v247_v5 = vld [vmem:[%s840_s5] sm:$0xff]  ;;  %580 = vmatmul.mubr.msk.f32.vlgmr.msra.gmra.mrb[0].mxu1 %vm140_vm4, %v38_v4  ;;  %571 = vmatprep.mubr.msk.f32.mxu0 %vm656_vm3, %v655_v0  ;;  %v631_v15 = vpack.c.bf16 %v250_v14, %v249_v13  ;;  %v351_v17 = vld [vmem:[%s841_s7 + $0x8] sm:$0xff]  ;;  %v352_v18 = vld [vmem:[%s841_s7 + $0x10] sm:$0xff] }
   0x6   :  { %582 = vmatprep.mubr.msk.f32.mxu1 %vm656_vm3, %v655_v0  ;;  %v628_v9 = vpack.c.bf16 %v248_v6, %v247_v5  ;;  %633 = vmatprep.subr.bf16.mxu1 %v657_v10  ;;  %v350_v16 = vld [vmem:[%s841_s7] sm:$0xff]  ;;  %v353_v20 = vld [vmem:[%s841_s7 + $0x18] sm:$0xff]  ;;  %v436_v48 = vld [vmem:[%s844_s9 + $0x8] sm:$0xff] }
   0x7   :  { %v634_v19 = vpack.c.bf16 %v351_v17, %v350_v16  ;;  %v637_v21 = vpack.c.bf16 %v353_v20, %v352_v18  ;;  %v532_v24 = vld [vmem:[%s842_s4] ss:$0 sm:$0xff]  ;;  %v437_v53 = vld [vmem:[%s844_s9 + $0x10] sm:$0xff]  ;;  %v438_v54 = vld [vmem:[%s844_s9 + $0x18] sm:$0xff] }
   0x8   :  { %629 = vmatpush3.bf16.msra.mxu0 %v628_v9  ;;  %v533_v44 = vld [vmem:[%s843_s6] ss:$0 sm:$0xff]  ;;  %v643_v55 = vpack.c.bf16 %v438_v54, %v437_v53 }
   0x9   :  { %572 = vmatmul.mubr.msk.f32.gmra.mrb[2].mxu0 %vm46_vm2, %v42_v7  ;;  %583 = vmatmul.mubr.msk.f32.gmra.mrb[2].mxu1 %vm140_vm4, %v39_v8  ;;  %v645_v45 = vadd.f32 %v533_v44, %v533_v44  ;;  %v435_v47 = vld [vmem:[%s844_s9] sm:$0xff] }
   0xa   :  { %574 = vmatprep.mubr.msk.f32.mxu0 %vm656_vm3, %v655_v0  ;;  %585 = vmatprep.mubr.msk.f32.mxu1 %vm656_vm3, %v655_v0  ;;  %v640_v50 = vpack.c.bf16 %v436_v48, %v435_v47  ;;  %v537_v56 = vld [vmem:[%s845_s8] ss:$0 sm:$0xff] }
   0xb   :  { %630 = vmatprep.subr.bf16.mxu0 %v657_v10  ;;  %635 = vmatpush3.bf16.msra.mxu1 %v634_v19  ;;  %v646_v46 = vadd.f32 %v645_v45, %v533_v44  ;;  %v539_v61 = vld [vmem:[%s846_s10] ss:$0 sm:$0xff] }
   0xc   :  { %632 = vmatpush3.bf16.msra.mxu0 %v631_v15  ;;  %636 = vmatprep.subr.bf16.mxu1 %v657_v10 }
   0xd   :  { %575 = vmatmul.mubr.msk.f32.gmra.mrb[4].mxu0 %vm46_vm2, %v43_v11  ;;  %586 = vmatmul.mubr.msk.f32.gmra.mrb[4].mxu1 %vm140_vm4, %v40_v12 }
   0xe   :  { %596 = vmatprep.mubr.msk.f32.mxu0 %vm656_vm3, %v655_v0  ;;  %613 = vmatprep.mubr.msk.f32.mxu1 %vm656_vm3, %v655_v0 }
   0xf   :  { %638 = vmatpush3.bf16.msra.mxu1 %v637_v21 }
  0x10   :  { %639 = vmatprep.subr.bf16.mxu1 %v657_v10 }
  0xd7   :  { %v126_v22 = vpop.f32.mrb[0].mxu0 }
  0xd8   :  { %v220_v23 = vpop.f32.mrb[0].mxu1  ;;  %v570_v26 = vpop.f32.mrb[1].mxu0 }
  0xd9   :  { %v221_v25 = vadd.f32 %v220_v23, %v126_v22  ;;  %v581_v27 = vpop.f32.mrb[1].mxu1 }
  0xdb   :  { %v241_v28 = vadd.f32 %v532_v24, %v221_v25 }
  0xdc   :  { %v131_v29 = vpop.f32.mrb[2].mxu0  ;;  %v225_v30 = vpop.f32.mrb[2].mxu1 }
  0xdd   :  { %v244_v31 = vmax.f32 %v241_v28, 0.0  ;;  %v226_v32 = vadd.f32 %v225_v30, %v131_v29  ;;  %v573_v33 = vpop.f32.mrb[3].mxu0  ;;  %v584_v34 = vpop.f32.mrb[3].mxu1 }
  0xdf   :  { %v242_v35 = vadd.f32 %v532_v24, %v226_v32  ;;  %597 = vmatmul.mubr.msk.f32.vlgmr.msra.gmra.mrb[6].mxu0 %vm258_vm5, %v244_v31 }
  0xe0   :  { %599 = vmatprep.mubr.msk.f32.mxu0 %vm656_vm3, %v655_v0  ;;  %v136_v36 = vpop.f32.mrb[4].mxu0  ;;  %v230_v37 = vpop.f32.mrb[4].mxu1 }
  0xe1   :  { %v231_v38 = vadd.f32 %v230_v37, %v136_v36  ;;  %v576_v39 = vpop.f32.mrb[5].mxu0  ;;  %v587_v40 = vpop.f32.mrb[5].mxu1  ;;  %v245_v41 = vmax.f32 %v242_v35, 0.0 }
  0xe3   :  { %v243_v42 = vadd.f32 %v532_v24, %v231_v38 }
  0xe5   :  { %v246_v43 = vmax.f32 %v243_v42, 0.0 }
  0xe7   :  { %600 = vmatmul.mubr.msk.f32.gmra.mrb[6].mxu0 %vm258_vm5, %v245_v41 }
  0xe8   :  { %602 = vmatprep.mubr.msk.f32.mxu0 %vm656_vm3, %v655_v0 }
  0xef   :  { %603 = vmatmul.mubr.msk.f32.gmra.mrb[6].mxu0 %vm258_vm5, %v246_v43 }
 0x1c2   :  { %v344_v49 = vpop.f32.mrb[6].mxu0 }
 0x1c3   :  { %v647_v51 = vadd.f32 %v646_v46, %v344_v49  ;;  %v604_v52 = vpop.f32.mrb[7].mxu0 }
 0x1c5   :  { %614 = vmatmul.mubr.msk.f32.vlgmr.msra.gmra.mrb[6].mxu1 %vm258_vm5, %v647_v51 }
 0x1c6   :  { %641 = vmatpush3.bf16.msra.mxu1 %v640_v50  ;;  %624 = vmatprep.mubr.msk.f32.mxu1 %vm656_vm3, %v655_v0 }
 0x1c7   :  { %642 = vmatprep.subr.bf16.mxu1 %v657_v10 }
 0x1ca   :  { %644 = vmatpush3.bf16.msra.mxu1 %v643_v55 }
 0x298   :  { %v430_v57 = vpop.f32.mrb[6].mxu1 }
 0x299   :  { %v431_v58 = vadd.f32 %v537_v56, %v430_v57  ;;  %v615_v59 = vpop.f32.mrb[7].mxu1 }
 0x29b   :  { %v434_v60 = vmax.f32 %v431_v58, 0.0 }
 0x29d   :  { %625 = vmatmul.mubr.msk.f32.vlgmr.msra.gmra.mrb[8].mxu1 %vm258_vm5, %v434_v60 }
 0x370   :  { %v515_v62 = vpop.f32.mrb[8].mxu1 }
 0x371   :  { %v516_v63 = vadd.f32 %v539_v61, %v515_v62  ;;  %v626_v0 = vpop.f32.mrb[9].mxu1 }
 0x373   :  { %519 = vst.msk [vmem:[%s847_s11] sm:$0xff] %vm140_vm4, %v516_v63 }

</bundles_post_ra>
